<compile_context>
chip_gen: v7x
topology: tpu7x:2x2x1
jax: 0.10.0
libtpu: 0.0.40
codegen_flags: <defaults>
</compile_context>

<pallas_src>
import functools

import jax
import jax.numpy as jnp
from jax import lax
from jax.experimental import pallas as pl
from jax.experimental.pallas import tpu as pltpu


def _round_up(n, m):
    return (n + m - 1) // m * m


def _consequent_kernel(x_ref, w_ref, o_ref):
    # x_ref: (TB, K)   batch tile of [x | 1] rows            (VMEM)
    # w_ref: (Np, K)   coeffs flattened o-major, zero-padded (VMEM, resident)
    # o_ref: (TB, Np)  lane-dense output tile                (VMEM)
    # o[b, n] = sum_k x[b, k] * w[n, k]   (transposed RHS is native on MXU)
    o_ref[...] = lax.dot_general(
        x_ref[...],
        w_ref[...],
        dimension_numbers=(((1,), (1,)), ((), ())),
        preferred_element_type=jnp.float32,
    ).astype(o_ref.dtype)


def consequent_forward_ref(x, coeffs):
    """Pure-JAX reference mirroring the PyTorch code exactly."""
    B = x.shape[0]
    x_new = jnp.concatenate([x, jnp.ones((B, 1), dtype=x.dtype)], axis=1)
    preds = jnp.matmul(coeffs, x_new.T)          # (R, O, B)
    return jnp.transpose(preds, (2, 1, 0))       # (B, O, R)


@functools.partial(jax.jit, static_argnames=("force_pallas",))
def consequent_forward(x, coeffs, *, force_pallas=False):
    """x: (B, in_num) f32, coeffs: (R, O, in_num+1) f32 -> (B, O, R) f32."""
    B, in_num = x.shape
    R, O, K = coeffs.shape
    assert K == in_num + 1

    # At toy scale the whole computation is smaller than kernel launch + DMA
    # setup; let XLA handle it unless explicitly forced onto the Pallas path.
    if not force_pallas and B * R * O * K < (1 << 16):
        return consequent_forward_ref(x, coeffs)

    # Fold the bias into the matmul: x_new = [x | 1]  -> (B, K).
    x_new = jnp.concatenate(
        [x.astype(jnp.float32), jnp.ones((B, 1), jnp.float32)], axis=1)

    # Batch tile: multiple of 8 sublanes (f32).  Pad B with zero rows.
    TB = min(512, _round_up(B, 8))
    Bp = _round_up(B, TB)
    if Bp != B:
        x_new = jnp.pad(x_new, ((0, Bp - B), (0, 0)))

    # Flatten coeffs o-major: row n = o*R + r holds coeffs[r, o, :].  Only the
    # two small leading axes are swapped (K stays minor), and rows are
    # zero-padded to a multiple of 128 so the kernel output is lane-dense.
    w2d = jnp.transpose(coeffs, (1, 0, 2)).reshape(O * R, K).astype(jnp.float32)
    Np = _round_up(O * R, 128)
    if Np != O * R:
        w2d = jnp.pad(w2d, ((0, Np - O * R), (0, 0)))

    # NOTE: on v6e/v7x at large B*R*O, casting x_new/w2d to bf16 (keeping the
    # f32 accumulator via preferred_element_type) halves HBM traffic; kept
    # f32 here for exactness at small scale.
    y2d = pl.pallas_call(
        _consequent_kernel,
        out_shape=jax.ShapeDtypeStruct((Bp, Np), jnp.float32),
        grid_spec=pltpu.PrefetchScalarGridSpec(
            num_scalar_prefetch=0,
            grid=(Bp // TB,),
            in_specs=[
                pl.BlockSpec((TB, K), lambda i: (i, 0)),   # batch-tiled x_new
                pl.BlockSpec((Np, K), lambda i: (0, 0)),   # weights stay resident
            ],
            out_specs=pl.BlockSpec((TB, Np), lambda i: (i, 0)),
        ),
        compiler_params=pltpu.CompilerParams(
            # Batch tiles are independent -> parallel (shards across the
            # two TensorCores on v7x; harmless on v5e/v6e).
            dimension_semantics=("parallel",),
        ),
    )(x_new, w2d)

    # Slice off padding; column n = o*R + r reshapes straight to (B, O, R),
    # no post-kernel transpose required.
    return y2d[:B, : O * R].reshape(B, O, R)


if __name__ == "__main__":
    key = jax.random.PRNGKey(0)
    k_x, k_c = jax.random.split(key)

    B, in_num, rule_num, out_num = 2, 4, 16, 3

    x = jax.random.normal(k_x, (B, in_num), dtype=jnp.float32)
    # Module __init__ uses zeros; use deterministic random values so the
    # kernel does non-trivial work (synthetic parameters, no checkpoint).
    coeffs = jax.random.normal(
        k_c, (rule_num, out_num, in_num + 1), dtype=jnp.float32
    )

    y = consequent_forward(x, coeffs, force_pallas=True)
    y = jax.block_until_ready(y)

    y_ref = consequent_forward_ref(x, coeffs)
    assert y.shape == (B, out_num, rule_num)
    assert jnp.allclose(y, y_ref, atol=1e-5, rtol=1e-5)

    print("KERNEL_OK")
</pallas_src>

<mosaic_0001>
module attributes {stable_mosaic.version = 11 : i64} {
  func.func @_consequent_kernel(%arg0: i32, %arg1: memref<8x5xf32, #tpu.memory_space<vmem>>, %arg2: memref<128x5xf32, #tpu.memory_space<vmem>>, %arg3: memref<8x128xf32, #tpu.memory_space<vmem>>) attributes {dimension_semantics = [#tpu.dimension_semantics<parallel>], iteration_bounds = array<i64: 1>, scalar_prefetch = 0 : i64, scratch_operands = 0 : i64, tpu.core_type = #tpu.core_type<tc>, window_params = [{transform_indices = @transform_0, window_bounds = array<i64: 8, 5>}, {pipeline_mode = #tpu.pipeline_mode<synchronous>, transform_indices = @transform_1, window_bounds = array<i64: 128, 5>}, {transform_indices = @transform_2, window_bounds = array<i64: 8, 128>}]} {
    %c0 = arith.constant 0 : index
    %c0_0 = arith.constant 0 : index
    %0 = vector.load %arg1[%c0, %c0_0] : memref<8x5xf32, #tpu.memory_space<vmem>>, vector<8x5xf32>
    %c0_1 = arith.constant 0 : index
    %c0_2 = arith.constant 0 : index
    %1 = vector.load %arg2[%c0_1, %c0_2] : memref<128x5xf32, #tpu.memory_space<vmem>>, vector<128x5xf32>
    %cst = arith.constant dense<0.000000e+00> : vector<8x128xf32>
    %2 = tpu.matmul %0, %1, %cst {dimension_numbers = #tpu.dot_dimension_numbers<[1], [1], [0], [0], [0, 0, 1, 0], [], []>} : vector<8x5xf32>, vector<128x5xf32>, vector<8x128xf32> -> vector<8x128xf32>
    %c0_3 = arith.constant 0 : index
    %c0_4 = arith.constant 0 : index
    %3 = vector.load %arg3[%c0_3, %c0_4] : memref<8x128xf32, #tpu.memory_space<vmem>>, vector<8x128xf32>
    tpu.vector_store %arg3[%c0_3, %c0_4], %2 {strides = array<i32>} : memref<8x128xf32, #tpu.memory_space<vmem>>, vector<8x128xf32>,
    return
  }
  func.func @transform_0(%arg0: i32) -> (i32, i32) {
    %c0_i32 = arith.constant 0 : i32
    %c0_i32_0 = arith.constant 0 : i32
    return %arg0, %c0_i32 : i32, i32
  }
  func.func @transform_1(%arg0: i32) -> (i32, i32) {
    %c0_i32 = arith.constant 0 : i32
    %c0_i32_0 = arith.constant 0 : i32
    %c0_i32_1 = arith.constant 0 : i32
    return %c0_i32, %c0_i32_0 : i32, i32
  }
  func.func @transform_2(%arg0: i32) -> (i32, i32) {
    %c0_i32 = arith.constant 0 : i32
    %c0_i32_0 = arith.constant 0 : i32
    return %arg0, %c0_i32 : i32, i32
  }
}

</mosaic_0001>

<bundles_post_ra>
// kernel: consequent_forward.1
= control target key start
LH: loop header
LB: loop body
LE: loop exit
PB: predicated region body
PF: predicated region fallthrough
CT: control target
= control target key end

     0   :  { %vm28_vm0 = vcmask 39936   ;;  %v259_v0 = vmov 0.0|0.0   ;;  %vm260_vm2 = vmmov 0   ;;  %v261_v4 = vmov 0.0   ;;  %s354_s1 = inlined_call_operand.vmem [shape: f32[128,5], index: 1, kind: input, shape index: {}]   ;;  %s355_s0 = inlined_call_operand.vmem [shape: f32[8,5], index: 0, kind: input, shape index: {}]   ;;  %s356_s2 = inlined_call_operand.vmem [shape: f32[8,128], index: 2, kind: output, shape index: {}]  }
   0x1   :  { %224 = vmatprep.subr.bf16.mxu0 %v259_v0  ;;  %v12_v1 = vld [vmem:[%s354_s1] sm:$0xff]  ;;  %v13_v2 = vld [vmem:[%s354_s1 + $0x8] sm:$0xff]  ;;  %vm285_vm1 = vmpackc.low %vm28_vm0, %vm28_vm0  ;;  %221 = vmatprep.mubr.msk.f32.mxu0 %vm260_vm2, %v261_v4 }
   0x2   :  { %v225_v5 = vpack.c.bf16 %v13_v2, %v12_v1  ;;  %v14_v6 = vld [vmem:[%s354_s1 + $0x10] sm:$0xff]  ;;  %v15_v7 = vld [vmem:[%s354_s1 + $0x18] sm:$0xff]  ;;  %v16_v9 = vld [vmem:[%s354_s1 + $0x20] sm:$0xff] }
   0x3   :  { %v229_v8 = vpack.c.bf16 %v15_v7, %v14_v6  ;;  %v17_v10 = vld [vmem:[%s354_s1 + $0x28] sm:$0xff]  ;;  %v18_v12 = vld [vmem:[%s354_s1 + $0x30] sm:$0xff]  ;;  %v19_v13 = vld [vmem:[%s354_s1 + $0x38] sm:$0xff] }
   0x4   :  { %227 = vmatpush3.bf16.xpose.msk.msra.mxu0 %vm285_vm1, %v225_v5  ;;  %v233_v11 = vpack.c.bf16 %v17_v10, %v16_v9  ;;  %v237_v14 = vpack.c.bf16 %v19_v13, %v18_v12  ;;  %v20_v15 = vld [vmem:[%s354_s1 + $0x40] sm:$0xff]  ;;  %v21_v16 = vld [vmem:[%s354_s1 + $0x48] sm:$0xff]  ;;  %v22_v18 = vld [vmem:[%s354_s1 + $0x50] sm:$0xff] }
   0x5   :  { %228 = vmatprep.subr.bf16.mxu0 %v259_v0  ;;  %v241_v17 = vpack.c.bf16 %v21_v16, %v20_v15  ;;  %v23_v19 = vld [vmem:[%s354_s1 + $0x58] sm:$0xff]  ;;  %v24_v21 = vld [vmem:[%s354_s1 + $0x60] sm:$0xff]  ;;  %v25_v22 = vld [vmem:[%s354_s1 + $0x68] sm:$0xff] }
   0x6   :  { %v245_v20 = vpack.c.bf16 %v23_v19, %v22_v18  ;;  %v249_v23 = vpack.c.bf16 %v25_v22, %v24_v21  ;;  %v26_v24 = vld [vmem:[%s354_s1 + $0x70] sm:$0xff]  ;;  %v27_v25 = vld [vmem:[%s354_s1 + $0x78] sm:$0xff]  ;;  %v11_v27 = vld [vmem:[%s355_s0] sm:$0xff] }
   0x7   :  { %v253_v26 = vpack.c.bf16 %v27_v25, %v26_v24 }
   0xc   :  { %231 = vmatpush3.bf16.xpose.msk.msra.mxu0 %vm285_vm1, %v229_v8 }
   0xd   :  { %232 = vmatprep.subr.bf16.mxu0 %v259_v0 }
  0x14   :  { %235 = vmatpush3.bf16.xpose.msk.msra.mxu0 %vm285_vm1, %v233_v11 }
  0x15   :  { %236 = vmatprep.subr.bf16.mxu0 %v259_v0 }
  0x1c   :  { %239 = vmatpush3.bf16.xpose.msk.msra.mxu0 %vm285_vm1, %v237_v14 }
  0x1d   :  { %240 = vmatprep.subr.bf16.mxu0 %v259_v0 }
  0x24   :  { %243 = vmatpush3.bf16.xpose.msk.msra.mxu0 %vm285_vm1, %v241_v17 }
  0x25   :  { %244 = vmatprep.subr.bf16.mxu0 %v259_v0 }
  0x2c   :  { %247 = vmatpush3.bf16.xpose.msk.msra.mxu0 %vm285_vm1, %v245_v20 }
  0x2d   :  { %248 = vmatprep.subr.bf16.mxu0 %v259_v0 }
  0x34   :  { %251 = vmatpush3.bf16.xpose.msk.msra.mxu0 %vm285_vm1, %v249_v23 }
  0x35   :  { %252 = vmatprep.subr.bf16.mxu0 %v259_v0 }
  0x3c   :  { %255 = vmatpush3.bf16.xpose.msk.msra.mxu0 %vm285_vm1, %v253_v26 }
  0x43   :  { %222 = vmatmul.mubr.msk.f32.vlgmr.msra.gmra.mrb[0].mxu0 %vm28_vm0, %v11_v27 }
 0x116   :  { %v146_v28 = vpop.f32.mrb[0].mxu0 }
 0x117   :  { %150 = vst [vmem:[%s356_s2] sm:$0xff] %v146_v28  ;;  %v223_v29 = vpop.f32.mrb[1].mxu0 }

</bundles_post_ra>
